<compile_context>
chip_gen: v7x
topology: tpu7x:2x2x1
jax: 0.10.0
libtpu: 0.0.40
codegen_flags: <defaults>
</compile_context>

<pallas_src>
import functools

import jax
import jax.numpy as jnp
from jax.experimental import pallas as pl
from jax.experimental.pallas import tpu as pltpu

EPS = 1e-8  # matches torch.sqrt(y + 1e-08)


# ---------------------------------------------------------------------------
# Pallas kernel: entire MinibatchStddev fused in one invocation
# ---------------------------------------------------------------------------
def _mbstd_kernel(x_ref, o_ref, *, n, chw, hw):
    x = x_ref[...]                                        # (N, C*H*W) f32
    mu = jnp.mean(x, axis=0, keepdims=True)               # batch mean   (1, C*H*W)
    d = x - mu
    var = jnp.mean(d * d, axis=0, keepdims=True)          # biased var   (1, C*H*W)
    std = jnp.sqrt(var + EPS)                             # per-feature std (EUP)
    mean_std = jnp.mean(std, keepdims=True)               # scalar       (1, 1)

    # Pass-through channels, then the broadcast stddev channel (lane-aligned
    # static slices: chw and hw are the full/aligned extents).
    o_ref[:, :chw] = x
    o_ref[:, chw:] = jnp.broadcast_to(mean_std, (n, hw)).astype(o_ref.dtype)


# ---------------------------------------------------------------------------
# Wrapper
# ---------------------------------------------------------------------------
def minibatch_stddev(x):
    """x: (N, C, H, W) -> (N, C+1, H, W), same semantics as the PyTorch module."""
    N, C, H, W = x.shape
    chw, hw = C * H * W, H * W
    x2 = x.reshape(N, chw).astype(jnp.float32)            # NCHW row-major flatten (view)

    kernel = functools.partial(_mbstd_kernel, n=N, chw=chw, hw=hw)
    out = pl.pallas_call(
        kernel,
        out_shape=jax.ShapeDtypeStruct((N, chw + hw), jnp.float32),
        grid=(1,),
        in_specs=[pl.BlockSpec((N, chw), lambda i: (0, 0))],
        out_specs=pl.BlockSpec((N, chw + hw), lambda i: (0, 0)),
        compiler_params=pltpu.CompilerParams(
            dimension_semantics=("arbitrary",)),
    )(x2)

    # (N, (C+1)*H*W) row-major == torch.cat([x, y], dim=1) layout.
    return out.reshape(N, C + 1, H, W)


# Pure-JAX reference for correctness checking.
def _reference(x):
    mu = jnp.mean(x, axis=0, keepdims=True)
    var = jnp.mean((x - mu) ** 2, axis=0)
    std = jnp.sqrt(var + EPS)
    s = jnp.mean(std)
    y = jnp.full((x.shape[0], 1, x.shape[2], x.shape[3]), s, x.dtype)
    return jnp.concatenate([x, y], axis=1)


# ---------------------------------------------------------------------------
if __name__ == "__main__":
    N, C, H, W = 2, 4, 16, 16
    key = jax.random.PRNGKey(0)
    x = jax.random.normal(key, (N, C, H, W), jnp.float32)

    out = jax.block_until_ready(minibatch_stddev(x))
    assert out.shape == (N, C + 1, H, W)
    assert bool(jnp.all(jnp.isfinite(out)))

    ref = _reference(x)
    assert bool(jnp.allclose(out, ref, atol=1e-5, rtol=1e-5))
    print("KERNEL_OK")
</pallas_src>

<mosaic_0001>
module attributes {stable_mosaic.version = 11 : i64} {
  func.func @_mbstd_kernel(%arg0: i32, %arg1: memref<2x1024xf32, #tpu.memory_space<vmem>>, %arg2: memref<2x1280xf32, #tpu.memory_space<vmem>>) attributes {dimension_semantics = [#tpu.dimension_semantics<arbitrary>], iteration_bounds = array<i64: 1>, scalar_prefetch = 0 : i64, scratch_operands = 0 : i64, tpu.core_type = #tpu.core_type<tc>, window_params = [{pipeline_mode = #tpu.pipeline_mode<synchronous>, transform_indices = @transform_0, window_bounds = array<i64: 2, 1024>}, {pipeline_mode = #tpu.pipeline_mode<synchronous>, transform_indices = @transform_1, window_bounds = array<i64: 2, 1280>}]} {
    %c0 = arith.constant 0 : index
    %c0_0 = arith.constant 0 : index
    %0 = vector.load %arg1[%c0, %c0_0] : memref<2x1024xf32, #tpu.memory_space<vmem>>, vector<2x1024xf32>
    %cst = arith.constant dense<0.000000e+00> : vector<1024xf32>
    %1 = vector.multi_reduction <add>, %0, %cst [0] : vector<2x1024xf32> to vector<1024xf32>
    %2 = vector.shape_cast %1 : vector<1024xf32> to vector<1x1024xf32>
    %cst_1 = arith.constant 2.000000e+00 : f32
    %3 = vector.broadcast %cst_1 : f32 to vector<1x1024xf32>
    %4 = arith.divf %2, %3 : vector<1x1024xf32>
    %5 = vector.broadcast %4 : vector<1x1024xf32> to vector<2x1024xf32>
    %6 = arith.subf %0, %5 : vector<2x1024xf32>
    %7 = arith.mulf %6, %6 : vector<2x1024xf32>
    %cst_2 = arith.constant dense<0.000000e+00> : vector<1024xf32>
    %8 = vector.multi_reduction <add>, %7, %cst_2 [0] : vector<2x1024xf32> to vector<1024xf32>
    %9 = vector.shape_cast %8 : vector<1024xf32> to vector<1x1024xf32>
    %cst_3 = arith.constant 2.000000e+00 : f32
    %10 = vector.broadcast %cst_3 : f32 to vector<1x1024xf32>
    %11 = arith.divf %9, %10 : vector<1x1024xf32>
    %cst_4 = arith.constant 9.99999993E-9 : f32
    %12 = vector.broadcast %cst_4 : f32 to vector<1x1024xf32>
    %13 = arith.addf %11, %12 : vector<1x1024xf32>
    %14 = math.sqrt %13 : vector<1x1024xf32>
    %15 = vector.shape_cast %14 : vector<1x1024xf32> to vector<1x1x1024xf32>
    %cst_5 = arith.constant dense<0.000000e+00> : vector<1xf32>
    %16 = vector.multi_reduction <add>, %15, %cst_5 [1, 2] : vector<1x1x1024xf32> to vector<1xf32>
    %17 = vector.shape_cast %16 : vector<1xf32> to vector<1x1x1xf32>
    %18 = vector.extract %17[0, 0, 0] : f32 from vector<1x1x1xf32>
    %19 = vector.broadcast %18 : f32 to vector<1x1xf32>
    %cst_6 = arith.constant 1.024000e+03 : f32
    %20 = vector.broadcast %cst_6 : f32 to vector<1x1xf32>
    %21 = arith.divf %19, %20 : vector<1x1xf32>
    %c0_7 = arith.constant 0 : index
    %c0_8 = arith.constant 0 : index
    %22 = vector.load %arg2[%c0_7, %c0_8] : memref<2x1280xf32, #tpu.memory_space<vmem>>, vector<2x1024xf32>
    tpu.vector_store %arg2[%c0_7, %c0_8], %0 {strides = array<i32>} : memref<2x1280xf32, #tpu.memory_space<vmem>>, vector<2x1024xf32>,
    %23 = vector.shape_cast %21 : vector<1x1xf32> to vector<1x1xf32>
    %24 = vector.broadcast %23 : vector<1x1xf32> to vector<2x256xf32>
    %c0_9 = arith.constant 0 : index
    %c1024 = arith.constant 1024 : index
    %25 = vector.load %arg2[%c0_9, %c1024] : memref<2x1280xf32, #tpu.memory_space<vmem>>, vector<2x256xf32>
    tpu.vector_store %arg2[%c0_9, %c1024], %24 {strides = array<i32>} : memref<2x1280xf32, #tpu.memory_space<vmem>>, vector<2x256xf32>,
    return
  }
  func.func @transform_0(%arg0: i32) -> (i32, i32) {
    %c0_i32 = arith.constant 0 : i32
    %c0_i32_0 = arith.constant 0 : i32
    %c0_i32_1 = arith.constant 0 : i32
    return %c0_i32, %c0_i32_0 : i32, i32
  }
  func.func @transform_1(%arg0: i32) -> (i32, i32) {
    %c0_i32 = arith.constant 0 : i32
    %c0_i32_0 = arith.constant 0 : i32
    %c0_i32_1 = arith.constant 0 : i32
    return %c0_i32, %c0_i32_0 : i32, i32
  }
}

</mosaic_0001>

<bundles_post_ra>
// kernel: tpu_custom_call.1
= control target key start
LH: loop header
LB: loop body
LE: loop exit
PB: predicated region body
PF: predicated region fallthrough
CT: control target
= control target key end

     0   :  { %6 = vsyncpa [#allocation3], 0  ;;  %s611_s0 = inlined_call_operand.hbm [shape: f32[2,1024], index: 0, kind: input, shape index: {}]   ;;  %s612_s1 = inlined_call_operand.hbm [shape: f32[2,1280], index: 1, kind: output, shape index: {}]  }
   0x1   :  { %7 = vsyncpa [#allocation4], 0  ;;  %s470_s6 = smov [#allocation2]   ;;  %s422_s10 = scalar_lea.hbm %s611_s0, 256 }
   0x2   :  { %s14_s7 = sshll.u32 %s470_s6, 4  ;;  %p423_p0 = scmp.ne.s32.totalorder %s611_s0, %s422_s10  ;;  %s15_s7 = int_to_ptr.vmem [resolvable:$true] %s14_s7 }
   0x3   :  { %p426_p1 = scmp.lt.u32.totalorder %s422_s10, %s611_s0 }
   0x5   :  { %p428_p2 = pnand %p426_p1, %p423_p0 }
   0x7   :  { %431 = shalt.err (!%p428_p2)
}
   0x8   :  { %s432_s15 = scalar_lea.vmem %s15_s7, 256  ;;  %p437_p4 = scmp.lt.s32.totalorder %s15_s7, %s15_s7 }
   0x9   :  { %p433_p3 = scmp.ne.s32.totalorder %s15_s7, %s432_s15  ;;  %p438_p5 = scmp.lt.s32.totalorder %s432_s15, %s432_s15 }
   0xb   :  { %p439_p6 = por %p438_p5, %p437_p4 }
   0xd   :  { %p440_p7 = pnand %p439_p6, %p433_p3 }
   0xf   :  { %443 = shalt.err (!%p440_p7)
}
  0x10   :  { %17 = dma.hbm_to_vmem [thread:$0]  %s611_s0, 256, %s15_s7, [#allocation3]  }
  0x11   :  { %466 = dma.done.wait [#allocation3], 256  }
  0x12   :  { %467 = vsyncadd [#allocation3], 4294967040  ;;  %v29_v0 = vlaneseq  ;;  %v471_v1 = vmov 1983009808   ;;  %v497_v6 = vld [vmem:[#allocation2] sm:$0xff]  ;;  %v499_v7 = vld [vmem:[#allocation2 + $0x8] sm:$0xff] }
  0x13   :  { %v27_v2 = vunpack.c.l.s4 %v471_v1  ;;  %vm67_vm0 = vcmask 1041408   ;;  %v25_v8 = vcombine.high %v497_v6, %v497_v6  ;;  %v42_v10 = vcombine.high %v499_v7, %v499_v7  ;;  %381 = vst [vmem:[#allocation5] sm:$0xff] %v497_v6  ;;  %382 = vst [vmem:[#allocation5 + $0x8] sm:$0xff] %v499_v7  ;;  %s472_s0 = smov [#allocation5]  }
  0x14   :  { %v30_v3 = vshrl.u32 %v29_v0, 7  ;;  %vm353_vm3 = vcmask 1040384   ;;  %s390_s18 = sshll.u32 %s472_s0, 4  ;;  %s391_s18 = int_to_ptr.vmem [resolvable:$true] %s390_s18 }
  0x15   :  { %v28_v4 = vunpack.c.0.s8 %v27_v2  ;;  %s444_s20 = scalar_lea.vmem %s391_s18, 320  ;;  %p449_p9 = scmp.lt.s32.totalorder %s391_s18, %s391_s18 }
  0x16   :  { %p445_p8 = scmp.ne.s32.totalorder %s391_s18, %s444_s20  ;;  %p450_p10 = scmp.lt.s32.totalorder %s444_s20, %s444_s20 }
  0x17   :  { %v495_v5 = vsub.s32 %v28_v4, %v30_v3 }
  0x18   :  { %p451_p11 = por %p450_p10, %p449_p9 }
  0x19   :  { %v32_v9 = vrot.slane %v497_v6, %v495_v5  ;;  %v49_v11 = vrot.slane %v499_v7, %v495_v5  ;;  %v39_v12 = vrot.slane %v25_v8, %v495_v5  ;;  %v56_v14 = vrot.slane %v42_v10, %v495_v5 }
  0x1a   :  { %p452_p12 = pnand %p451_p11, %p445_p8 }
  0x1b   :  { %v40_v13 = vcombine.high %v32_v9, %v32_v9  ;;  %v57_v15 = vcombine.high %v49_v11, %v49_v11  ;;  %v68_v16 = vsel %vm67_vm0, %v32_v9, 0.0  ;;  %v96_v17 = vsel %vm67_vm0, %v49_v11, 0.0 }
  0x1c   :  { %v41_v18 = vcombine.high %v39_v12, %v39_v12  ;;  %v58_v19 = vcombine.high %v56_v14, %v56_v14  ;;  %v69_v20 = vrot.slane %v68_v16, 4  ;;  %v82_v23 = vsel %vm67_vm0, %v39_v12, 0.0 }
  0x1d   :  { %v75_v21 = vsel %vm67_vm0, %v40_v13, 0.0  ;;  %v97_v24 = vrot.slane %v96_v17, 4  ;;  %v103_v25 = vsel %vm67_vm0, %v57_v15, 0.0  ;;  %v83_v27 = vrot.slane %v82_v23, 4 }
  0x1e   :  { %v76_v22 = vrot.slane %v75_v21, 4  ;;  %v70_v26 = vadd.f32 %v69_v20, %v68_v16  ;;  %v89_v28 = vsel %vm67_vm0, %v41_v18, 0.0  ;;  %v104_v29 = vrot.slane %v103_v25, 4 }
  0x1f   :  { %v90_v31 = vrot.slane %v89_v28, 4  ;;  %v98_v32 = vadd.f32 %v97_v24, %v96_v17  ;;  %v110_v33 = vsel %vm67_vm0, %v56_v14, 0.0  ;;  %v84_v35 = vadd.f32 %v83_v27, %v82_v23 }
  0x20   :  { %v77_v30 = vadd.f32 %v76_v22, %v75_v21  ;;  %v71_v34 = vrot.slane %v70_v26, 2  ;;  %v105_v36 = vadd.f32 %v104_v29, %v103_v25  ;;  %v111_v37 = vrot.slane %v110_v33, 4 }
  0x21   :  { %v91_v39 = vadd.f32 %v90_v31, %v89_v28  ;;  %v99_v40 = vrot.slane %v98_v32, 2  ;;  %v117_v41 = vsel %vm67_vm0, %v58_v19, 0.0  ;;  %v85_v43 = vrot.slane %v84_v35, 2 }
  0x22   :  { %v78_v38 = vrot.slane %v77_v30, 2  ;;  %v72_v42 = vadd.f32 %v71_v34, %v70_v26  ;;  %v106_v44 = vrot.slane %v105_v36, 2  ;;  %v112_v45 = vadd.f32 %v111_v37, %v110_v33 }
  0x23   :  { %v92_v47 = vrot.slane %v91_v39, 2  ;;  %v100_v48 = vadd.f32 %v99_v40, %v98_v32  ;;  %v118_v49 = vrot.slane %v117_v41, 4  ;;  %v86_v51 = vadd.f32 %v85_v43, %v84_v35 }
  0x24   :  { %v79_v46 = vadd.f32 %v78_v38, %v77_v30  ;;  %v73_v50 = vrot.slane %v72_v42, 1  ;;  %v107_v52 = vadd.f32 %v106_v44, %v105_v36  ;;  %v113_v53 = vrot.slane %v112_v45, 2 }
  0x25   :  { %v93_v55 = vadd.f32 %v92_v47, %v91_v39  ;;  %v101_v56 = vrot.slane %v100_v48, 1  ;;  %v119_v57 = vadd.f32 %v118_v49, %v117_v41  ;;  %v87_v59 = vrot.slane %v86_v51, 1 }
  0x26   :  { %v80_v54 = vrot.slane %v79_v46, 1  ;;  %v74_v58 = vadd.f32 %v73_v50, %v72_v42  ;;  %v108_v60 = vrot.slane %v107_v52, 1  ;;  %v114_v61 = vadd.f32 %v113_v53, %v112_v45 }
  0x27   :  { %v94_v63 = vrot.slane %v93_v55, 1  ;;  %v102_v0 = vadd.f32 %v101_v56, %v100_v48  ;;  %v120_v1 = vrot.slane %v119_v57, 2  ;;  %v88_v2 = vadd.f32 %v87_v59, %v86_v51 }
  0x28   :  { %v81_v62 = vadd.f32 %v80_v54, %v79_v46  ;;  %v109_v3 = vadd.f32 %v108_v60, %v107_v52  ;;  %v115_v4 = vrot.slane %v114_v61, 1  ;;  %v125_v8 = vmul.f32 0.5, %v74_v58 }
  0x29   :  { %v95_v9 = vadd.f32 %v94_v63, %v93_v55  ;;  %v121_v10 = vadd.f32 %v120_v1, %v119_v57  ;;  %v129_v12 = vmul.f32 0.5, %v102_v0  ;;  %v127_v14 = vmul.f32 0.5, %v88_v2 }
  0x2a   :  { %v126_v11 = vmul.f32 0.5, %v81_v62  ;;  %v116_v13 = vadd.f32 %v115_v4, %v114_v61  ;;  %v130_v15 = vmul.f32 0.5, %v109_v3 }
  0x2b   :  { %v122_v16 = vrot.slane %v121_v10, 1  ;;  %v128_v17 = vmul.f32 0.5, %v95_v9 }
  0x2c   :  { %v141_v18 = vcombine.low %v125_v8, %v126_v11  ;;  %v131_v19 = vmul.f32 0.5, %v116_v13  ;;  %v158_v23 = vcombine.low %v129_v12, %v130_v15 }
  0x2d   :  { %v123_v20 = vadd.f32 %v122_v16, %v121_v10  ;;  %v142_v21 = vcombine.low %v127_v14, %v128_v17 }
  0x2e   :  { %v149_v22 = vrot.slane %v141_v18, %v495_v5  ;;  %v166_v28 = vrot.slane %v158_v23, %v495_v5 }
  0x2f   :  { %v132_v24 = vmul.f32 0.5, %v123_v20  ;;  %v156_v25 = vrot.slane %v142_v21, %v495_v5 }
  0x31   :  { %v157_v26 = vcombine.low %v149_v22, %v156_v25  ;;  %v159_v27 = vcombine.low %v131_v19, %v132_v24 }
  0x33   :  { %v173_v29 = vrot.slane %v159_v27, %v495_v5  ;;  %v177_v30 = vsub.f32 %v497_v6, %v157_v26 }
  0x35   :  { %v174_v31 = vcombine.low %v166_v28, %v173_v29  ;;  %v179_v32 = vmul.f32 %v177_v30, %v177_v30 }
  0x37   :  { %v178_v33 = vsub.f32 %v499_v7, %v174_v31  ;;  %v183_v34 = vcombine.high %v179_v32, %v179_v32  ;;  %v190_v35 = vrot.slane %v179_v32, %v495_v5 }
  0x39   :  { %v180_v36 = vmul.f32 %v178_v33, %v178_v33  ;;  %v197_v37 = vrot.slane %v183_v34, %v495_v5  ;;  %v198_v38 = vcombine.high %v190_v35, %v190_v35  ;;  %v225_v39 = vsel %vm67_vm0, %v190_v35, 0.0 }
  0x3a   :  { %v226_v40 = vrot.slane %v225_v39, 4 }
  0x3b   :  { %v199_v41 = vcombine.high %v197_v37, %v197_v37  ;;  %v200_v42 = vcombine.high %v180_v36, %v180_v36  ;;  %v207_v43 = vrot.slane %v180_v36, %v495_v5  ;;  %v232_v6 = vsel %vm67_vm0, %v198_v38, 0.0 }
  0x3c   :  { %v227_v44 = vadd.f32 %v226_v40, %v225_v39  ;;  %v233_v45 = vrot.slane %v232_v6, 4  ;;  %v239_v7 = vsel %vm67_vm0, %v197_v37, 0.0 }
  0x3d   :  { %v214_v46 = vrot.slane %v200_v42, %v495_v5  ;;  %v215_v47 = vcombine.high %v207_v43, %v207_v43  ;;  %v240_v48 = vrot.slane %v239_v7, 4  ;;  %v246_v49 = vsel %vm67_vm0, %v199_v41, 0.0 }
  0x3e   :  { %v228_v50 = vrot.slane %v227_v44, 2  ;;  %v234_v51 = vadd.f32 %v233_v45, %v232_v6  ;;  %v247_v52 = vrot.slane %v246_v49, 4  ;;  %v253_v53 = vsel %vm67_vm0, %v207_v43, 0.0 }
  0x3f   :  { %v216_v54 = vcombine.high %v214_v46, %v214_v46  ;;  %v241_v55 = vadd.f32 %v240_v48, %v239_v7  ;;  %v254_v56 = vrot.slane %v253_v53, 4  ;;  %v260_v57 = vsel %vm67_vm0, %v215_v47, 0.0 }
  0x40   :  { %v229_v58 = vadd.f32 %v228_v50, %v227_v44  ;;  %v235_v59 = vrot.slane %v234_v51, 2  ;;  %v248_v60 = vadd.f32 %v247_v52, %v246_v49  ;;  %v261_v61 = vrot.slane %v260_v57, 4 }
  0x41   :  { %v242_v62 = vrot.slane %v241_v55, 2  ;;  %v255_v5 = vadd.f32 %v254_v56, %v253_v53  ;;  %v267_v63 = vsel %vm67_vm0, %v214_v46, 0.0  ;;  %v274_v0 = vsel %vm67_vm0, %v216_v54, 0.0 }
  0x42   :  { %v230_v1 = vrot.slane %v229_v58, 1  ;;  %v236_v2 = vadd.f32 %v235_v59, %v234_v51  ;;  %v249_v3 = vrot.slane %v248_v60, 2  ;;  %v262_v4 = vadd.f32 %v261_v61, %v260_v57 }
  0x43   :  { %v243_v8 = vadd.f32 %v242_v62, %v241_v55  ;;  %v256_v9 = vrot.slane %v255_v5, 2  ;;  %v268_v10 = vrot.slane %v267_v63, 4  ;;  %v275_v11 = vrot.slane %v274_v0, 4 }
  0x44   :  { %v231_v12 = vadd.f32 %v230_v1, %v229_v58  ;;  %v237_v13 = vrot.slane %v236_v2, 1  ;;  %v250_v14 = vadd.f32 %v249_v3, %v248_v60  ;;  %v263_v15 = vrot.slane %v262_v4, 2 }
  0x45   :  { %v244_v16 = vrot.slane %v243_v8, 1  ;;  %v257_v17 = vadd.f32 %v256_v9, %v255_v5  ;;  %v269_v18 = vadd.f32 %v268_v10, %v267_v63  ;;  %v276_v19 = vadd.f32 %v275_v11, %v274_v0 }
  0x46   :  { %v238_v20 = vadd.f32 %v237_v13, %v236_v2  ;;  %v251_v21 = vrot.slane %v250_v14, 1  ;;  %v264_v22 = vadd.f32 %v263_v15, %v262_v4  ;;  %v281_v23 = vmul.f32 0.5, %v231_v12 }
  0x47   :  { %v245_v24 = vadd.f32 %v244_v16, %v243_v8  ;;  %v258_v25 = vrot.slane %v257_v17, 1  ;;  %v270_v26 = vrot.slane %v269_v18, 2  ;;  %v277_v27 = vrot.slane %v276_v19, 2 }
  0x48   :  { %v252_v28 = vadd.f32 %v251_v21, %v250_v14  ;;  %v265_v29 = vrot.slane %v264_v22, 1  ;;  %v282_v30 = vmul.f32 0.5, %v238_v20  ;;  %v289_v31 = vadd.f32 1e-08, %v281_v23 }
  0x49   :  { %v259_v32 = vadd.f32 %v258_v25, %v257_v17  ;;  %v271_v33 = vadd.f32 %v270_v26, %v269_v18  ;;  %v278_v34 = vadd.f32 %v277_v27, %v276_v19  ;;  %v283_v35 = vmul.f32 0.5, %v245_v24 }
  0x4a   :  { %v266_v36 = vadd.f32 %v265_v29, %v264_v22  ;;  %v284_v37 = vmul.f32 0.5, %v252_v28  ;;  %v290_v38 = vadd.f32 1e-08, %v282_v30  ;;  %406 = vrsqrt.f32 %v289_v31 }
  0x4b   :  { %v272_v39 = vrot.slane %v271_v33, 1  ;;  %v279_v40 = vrot.slane %v278_v34, 1  ;;  %v285_v41 = vmul.f32 0.5, %v259_v32  ;;  %v291_v42 = vadd.f32 1e-08, %v283_v35 }
  0x4c   :  { %v286_v43 = vmul.f32 0.5, %v266_v36  ;;  %v292_v6 = vadd.f32 1e-08, %v284_v37  ;;  %408 = vrsqrt.f32 %v290_v38  ;;  %vm299_vm1 = vcmp.eq.f32.partialorder %v289_v31, inf }
  0x4d   :  { %v273_v44 = vadd.f32 %v272_v39, %v271_v33  ;;  %v280_v45 = vadd.f32 %v279_v40, %v278_v34  ;;  %v539_v7 = vadd.f32 1e-08, %v285_v41  ;;  %410 = vrsqrt.f32 %v291_v42 }
  0x4e   :  { %v541_v48 = vadd.f32 1e-08, %v286_v43  ;;  %412 = vrsqrt.f32 %v292_v6  ;;  %v302_v52 = vand.u32 2147483648, %v289_v31  ;;  %vm301_vm2 = vcmp.eq.f32.partialorder %v289_v31, 0.0 }
  0x4f   :  { %v287_v46 = vmul.f32 0.5, %v273_v44  ;;  %v288_v47 = vmul.f32 0.5, %v280_v45  ;;  %414 = vrsqrt.f32 %v539_v7  ;;  %vm306_vm4 = vcmp.eq.f32.partialorder %v290_v38, inf }
  0x50   :  { %416 = vrsqrt.f32 %v541_v48  ;;  %vm308_vm5 = vcmp.eq.f32.partialorder %v290_v38, 0.0  ;;  %v309_v54 = vand.u32 2147483648, %v290_v38  ;;  %vm313_vm6 = vcmp.eq.f32.partialorder %v291_v42, inf }
  0x51   :  { %v543_v49 = vadd.f32 1e-08, %v287_v46  ;;  %v545_v50 = vadd.f32 1e-08, %v288_v47  ;;  %vm315_vm7 = vcmp.eq.f32.partialorder %v291_v42, 0.0  ;;  %v316_v56 = vand.u32 2147483648, %v291_v42 }
  0x52   :  { %vm320_vm8 = vcmp.eq.f32.partialorder %v292_v6, inf  ;;  %vm322_vm9 = vcmp.eq.f32.partialorder %v292_v6, 0.0  ;;  %v323_v59 = vand.u32 2147483648, %v292_v6  ;;  %vm327_vm10 = vcmp.eq.f32.partialorder %v539_v7, inf }
  0x53   :  { %418 = vrsqrt.f32 %v543_v49  ;;  %vm329_vm11 = vcmp.eq.f32.partialorder %v539_v7, 0.0  ;;  %v330_v62 = vand.u32 2147483648, %v539_v7  ;;  %vm334_vm12 = vcmp.eq.f32.partialorder %v541_v48, inf }
  0x54   :  { %v407_v51 = vpop.eup %406  ;;  %420 = vrsqrt.f32 %v545_v50  ;;  %vm336_vm13 = vcmp.eq.f32.partialorder %v541_v48, 0.0  ;;  %v337_v0 = vand.u32 2147483648, %v541_v48  ;;  %vm341_vm14 = vcmp.eq.f32.partialorder %v543_v49, inf }
  0x55   :  { %v298_v53 = vmul.f32 %v407_v51, %v289_v31  ;;  %vm343_vm15 = vcmp.eq.f32.partialorder %v543_v49, 0.0  ;;  %v344_v10 = vand.u32 2147483648, %v543_v49  ;;  %vm348_vm0 = vcmp.eq.f32.partialorder %v545_v50, inf }
  0x56   :  { %v409_v57 = vpop.eup %408  ;;  %v351_v24 = vand.u32 2147483648, %v545_v50 }
  0x57   :  { %v300_v55 = vsel %vm299_vm1, %v289_v31, %v298_v53  ;;  %v411_v60 = vpop.eup %410  ;;  %v305_v61 = vmul.f32 %v409_v57, %v290_v38  ;;  %vm350_vm1 = vcmp.eq.f32.partialorder %v545_v50, 0.0 }
  0x58   :  { %v303_v58 = vsel %vm301_vm2, %v302_v52, %v300_v55  ;;  %v413_v5 = vpop.eup %412  ;;  %v312_v63 = vmul.f32 %v411_v60, %v291_v42 }
  0x59   :  { %v307_v1 = vsel %vm306_vm4, %v290_v38, %v305_v61  ;;  %v319_v2 = vmul.f32 %v413_v5, %v292_v6  ;;  %v354_v3 = vsel %vm353_vm3, %v303_v58, 0.0  ;;  %v415_v4 = vpop.eup %414 }
  0x5a   :  { %v310_v8 = vsel %vm308_vm5, %v309_v54, %v307_v1  ;;  %v314_v9 = vsel %vm313_vm6, %v291_v42, %v312_v63  ;;  %v417_v11 = vpop.eup %416  ;;  %v326_v14 = vmul.f32 %v415_v4, %v539_v7 }
  0x5b   :  { %v317_v12 = vsel %vm315_vm7, %v316_v56, %v314_v9  ;;  %v321_v13 = vsel %vm320_vm8, %v292_v6, %v319_v2  ;;  %v355_v15 = vsel %vm353_vm3, %v310_v8, 0.0  ;;  %v333_v18 = vmul.f32 %v417_v11, %v541_v48 }
  0x5c   :  { %v324_v17 = vsel %vm322_vm9, %v323_v59, %v321_v13  ;;  %v356_v19 = vadd.f32 %v355_v15, %v354_v3  ;;  %v357_v20 = vsel %vm353_vm3, %v317_v12, 0.0  ;;  %v328_v22 = vsel %vm327_vm10, %v539_v7, %v326_v14 }
  0x5d   :  { %v419_v16 = vpop.eup %418  ;;  %v359_v25 = vsel %vm353_vm3, %v324_v17, 0.0  ;;  %v331_v26 = vsel %vm329_vm11, %v330_v62, %v328_v22  ;;  %v335_v27 = vsel %vm334_vm12, %v541_v48, %v333_v18 }
  0x5e   :  { %v421_v21 = vpop.eup %420  ;;  %v340_v23 = vmul.f32 %v419_v16, %v543_v49  ;;  %v358_v29 = vadd.f32 %v357_v20, %v356_v19  ;;  %v338_v30 = vsel %vm336_vm13, %v337_v0, %v335_v27  ;;  %v361_v32 = vsel %vm353_vm3, %v331_v26, 0.0 }
  0x5f   :  { %v347_v28 = vmul.f32 %v421_v21, %v545_v50  ;;  %v363_v36 = vsel %vm353_vm3, %v338_v30, 0.0 }
  0x60   :  { %v342_v31 = vsel %vm341_vm14, %v543_v49, %v340_v23  ;;  %v360_v35 = vadd.f32 %v359_v25, %v358_v29 }
  0x61   :  { %v345_v33 = vsel %vm343_vm15, %v344_v10, %v342_v31  ;;  %v349_v34 = vsel %vm348_vm0, %v545_v50, %v347_v28 }
  0x62   :  { %v352_v37 = vsel %vm350_vm1, %v351_v24, %v349_v34  ;;  %v362_v38 = vadd.f32 %v361_v32, %v360_v35  ;;  %v365_v39 = vsel %vm353_vm3, %v345_v33, 0.0 }
  0x63   :  { %v367_v41 = vsel %vm353_vm3, %v352_v37, 0.0 }
  0x64   :  { %v364_v40 = vadd.f32 %v363_v36, %v362_v38 }
  0x66   :  { %v366_v42 = vadd.f32 %v365_v39, %v364_v40 }
  0x68   :  { %v368_v43 = vadd.f32 %v367_v41, %v366_v42 }
  0x6a   :  { %369 = vadd.xlane.f32.xlu0 %v368_v43 }
  0xf7   :  { %v370_v6 = vpop.xlane.xlu0 %369 }
  0xf8   :  { %v371_v44 = vrot.slane %v370_v6, 4 }
  0xfa   :  { %v372_v45 = vadd.f32 %v371_v44, %v370_v6 }
  0xfc   :  { %v373_v7 = vrot.slane %v372_v45, 2 }
  0xfe   :  { %v374_v46 = vadd.f32 %v373_v7, %v372_v45 }
 0x100   :  { %v375_v47 = vrot.slane %v374_v46, 1 }
 0x102   :  { %v376_v48 = vadd.f32 %v375_v47, %v374_v46 }
 0x104   :  { %399 = vpush %v376_v48 }
 0x135   :  { %s400_s19 = spop %399 }
 0x136   :  { %v378_v49 = vstv %s400_s19 }
 0x137   :  { %v380_v50 = vmul.f32 0.0009765625, %v378_v49 }
 0x139   :  { %383 = vst [vmem:[#allocation5 + $0x10] sm:$0xf] %v380_v50 }
 0x13a   :  { %455 = shalt.err (!%p452_p12)
}
 0x13b   :  { %s456_s23 = scalar_lea.hbm %s612_s1, 320 }
 0x13c   :  { %p457_p13 = scmp.ne.s32.totalorder %s612_s1, %s456_s23  ;;  %p460_p0 = scmp.lt.u32.totalorder %s456_s23, %s612_s1 }
 0x13e   :  { %p462_p1 = pnand %p460_p0, %p457_p13 }
 0x140   :  { %465 = shalt.err (!%p462_p1)
}
 0x141   :  { %393 = dma.vmem_to_hbm [thread:$0]  %s391_s18, 320, %s612_s1, [#allocation4]  }
 0x142   :  { %468 = dma.done.wait [#allocation4], 320  }
 0x143   :  { %469 = vsyncadd [#allocation4], 4294966976 }
 0x144   :  { %397 = vsyncpa [#allocation3], 1 }
 0x145   :  { %398 = vsyncpa [#allocation4], 1 }

</bundles_post_ra>
